<compile_context>
chip_gen: v5e
topology: v5e:2x2
jax: 0.10.0
libtpu: 0.0.40
codegen_flags: <defaults>
</compile_context>

<pallas_src>
import jax
import jax.numpy as jnp
from jax.experimental import pallas as pl
from jax.experimental.pallas import tpu as pltpu


# ---------------------------------------------------------------------------
# Recommended path: exact equivalent of Mul.forward, zero data movement.
# ---------------------------------------------------------------------------
def mul_forward(q, k):
    """Pallas-side equivalent of Mul.forward: returns the inputs untouched.

    Any copy (Pallas or XLA) would be pure wasted HBM bandwidth for a
    semantic no-op, so no kernel is launched on this path.
    """
    return (q, k)


# ---------------------------------------------------------------------------
# Optional marker-kernel variant (one fused pallas_call for both tensors).
# ---------------------------------------------------------------------------
def _fused_copy_kernel(q_ref, k_ref, qo_ref, ko_ref):
    # Pure pass-through of the current tiles.  No casts, no compute.
    qo_ref[...] = q_ref[...]
    ko_ref[...] = k_ref[...]


_WHOLE_ARRAY_BYTES = 4 * 1024 * 1024  # per-tensor cap for the grid-less path


def _slab_geometry(n, itemsize, *, tm_target=256, lane_target=1024):
    """Pick a lane-dense (rows, lane) view + row tile for a flat copy.

    Returns (rows, lane, tm, grid_steps) or None when `n` has no 128-multiple
    factorisation (ragged); the caller then falls back to another path.
    """
    sublane = max(8, 32 // itemsize)  # 8 for f32, 16 for bf16, 32 for int8/fp8
    lane = next((c for c in (lane_target, 512, 256, 128) if n % c == 0), None)
    if lane is None:
        return None
    rows = n // lane
    if rows < 2 * sublane:
        tm = rows  # single full-extent block (legal regardless of sublane)
    else:
        # Aim for >=2 grid steps so a 2-TC (v7x) part can split the copy.
        half = ((rows + 1) // 2 + sublane - 1) // sublane * sublane
        tm = max(sublane, min(tm_target, half))
    return rows, lane, tm, pl.cdiv(rows, tm)


def _fused_whole_copy(q, k):
    """Small tensors: one grid-less call, whole arrays as single VMEM blocks."""
    return pl.pallas_call(
        _fused_copy_kernel,
        out_shape=(
            jax.ShapeDtypeStruct(q.shape, q.dtype),
            jax.ShapeDtypeStruct(k.shape, k.dtype),
        ),
    )(q, k)


def _fused_tiled_copy(q, k, rows, lane, tm, grid_steps):
    """Large tensors: one fused tiled call over lane-dense 2-D slabs."""
    qs = q.reshape(rows, lane)  # contiguous reshape: metadata only, no HBM pass
    ks = k.reshape(rows, lane)
    spec = pl.BlockSpec((tm, lane), lambda i: (i, 0))
    qo, ko = pl.pallas_call(
        _fused_copy_kernel,
        out_shape=(
            jax.ShapeDtypeStruct((rows, lane), q.dtype),
            jax.ShapeDtypeStruct((rows, lane), k.dtype),
        ),
        grid=(grid_steps,),
        in_specs=[spec, spec],
        out_specs=(spec, spec),
        compiler_params=pltpu.CompilerParams(
            dimension_semantics=("parallel",),
        ),
    )(qs, ks)
    return qo.reshape(q.shape), ko.reshape(k.shape)


def mul_forward_pallas(q, k, *, tm=256, lane=1024):
    """Marker variant: routes q and k through ONE fused Pallas copy kernel."""
    q_bytes = q.size * q.dtype.itemsize
    k_bytes = k.size * k.dtype.itemsize

    # Small-tensor fast path: single grid-less call, no tiling bookkeeping.
    if q_bytes <= _WHOLE_ARRAY_BYTES and k_bytes <= _WHOLE_ARRAY_BYTES:
        return _fused_whole_copy(q, k)

    # Large tensors with identical flat geometry: one fused tiled call.
    if q.size == k.size and q.dtype == k.dtype:
        geom = _slab_geometry(q.size, q.dtype.itemsize,
                              tm_target=tm, lane_target=lane)
        if geom is not None:
            return _fused_tiled_copy(q, k, *geom)

    # TODO(synk): large ragged / mismatched q,k — the module is a pure
    # pass-through, so returning the inputs unchanged is exactly correct and
    # strictly faster than any copy kernel.
    return (q, k)


if __name__ == "__main__":
    key = jax.random.PRNGKey(0)
    kq, kk = jax.random.split(key, 2)

    # Small shapes consistent with ViT attention usage of Mul(q, k):
    # (batch, heads, tokens, head_dim)
    B, H, N, D = 2, 4, 16, 32
    q = jax.random.normal(kq, (B, H, N, D), jnp.float32)
    k = jax.random.normal(kk, (B, H, N, D), jnp.float32)

    # Recommended path: exact tuple pass-through (zero data movement).
    q0, k0 = mul_forward(q, k)
    assert q0 is q and k0 is k

    # Marker-kernel path: one fused Pallas call copying both tensors
    # (grid-less whole-array blocks at this size).
    q_out, k_out = mul_forward_pallas(q, k)
    q_out = jax.block_until_ready(q_out)
    k_out = jax.block_until_ready(k_out)

    assert q_out.shape == q.shape and q_out.dtype == q.dtype
    assert k_out.shape == k.shape and k_out.dtype == k.dtype
    # Exact pass-through: bitwise equality with the inputs (the reference
    # semantics of `return (q, k)`).
    assert bool(jnp.array_equal(q_out, q)), "q mismatch vs reference"
    assert bool(jnp.array_equal(k_out, k)), "k mismatch vs reference"

    # Exercise the large-tensor tiled path once as well (8 MiB per tensor):
    # lane-dense (256, 1024) blocks, 8 grid steps, single fused call.
    big_q = jax.random.normal(kq, (2048, 1024), jnp.float32)
    big_k = jax.random.normal(kk, (2048, 1024), jnp.float32)
    bq_out, bk_out = mul_forward_pallas(big_q, big_k)
    jax.block_until_ready((bq_out, bk_out))
    assert bool(jnp.array_equal(bq_out, big_q)), "big q mismatch vs reference"
    assert bool(jnp.array_equal(bk_out, big_k)), "big k mismatch vs reference"

    print("KERNEL_OK")
</pallas_src>

<mosaic_0001>
module attributes {stable_mosaic.version = 11 : i64} {
  func.func @_fused_copy_kernel(%arg0: memref<2x4x16x32xf32, #tpu.memory_space<vmem>>, %arg1: memref<2x4x16x32xf32, #tpu.memory_space<vmem>>, %arg2: memref<2x4x16x32xf32, #tpu.memory_space<vmem>>, %arg3: memref<2x4x16x32xf32, #tpu.memory_space<vmem>>) attributes {dimension_semantics = [], scalar_prefetch = 0 : i64, scratch_operands = 0 : i64, tpu.core_type = #tpu.core_type<tc>} {
    %c0 = arith.constant 0 : index
    %c0_0 = arith.constant 0 : index
    %c0_1 = arith.constant 0 : index
    %c0_2 = arith.constant 0 : index
    %0 = vector.load %arg0[%c0, %c0_0, %c0_1, %c0_2] : memref<2x4x16x32xf32, #tpu.memory_space<vmem>>, vector<2x4x16x32xf32>
    %c0_3 = arith.constant 0 : index
    %c0_4 = arith.constant 0 : index
    %c0_5 = arith.constant 0 : index
    %c0_6 = arith.constant 0 : index
    %1 = vector.load %arg2[%c0_3, %c0_4, %c0_5, %c0_6] : memref<2x4x16x32xf32, #tpu.memory_space<vmem>>, vector<2x4x16x32xf32>
    tpu.vector_store %arg2[%c0_3, %c0_4, %c0_5, %c0_6], %0 {strides = array<i32>} : memref<2x4x16x32xf32, #tpu.memory_space<vmem>>, vector<2x4x16x32xf32>,
    %c0_7 = arith.constant 0 : index
    %c0_8 = arith.constant 0 : index
    %c0_9 = arith.constant 0 : index
    %c0_10 = arith.constant 0 : index
    %2 = vector.load %arg1[%c0_7, %c0_8, %c0_9, %c0_10] : memref<2x4x16x32xf32, #tpu.memory_space<vmem>>, vector<2x4x16x32xf32>
    %c0_11 = arith.constant 0 : index
    %c0_12 = arith.constant 0 : index
    %c0_13 = arith.constant 0 : index
    %c0_14 = arith.constant 0 : index
    %3 = vector.load %arg3[%c0_11, %c0_12, %c0_13, %c0_14] : memref<2x4x16x32xf32, #tpu.memory_space<vmem>>, vector<2x4x16x32xf32>
    tpu.vector_store %arg3[%c0_11, %c0_12, %c0_13, %c0_14], %2 {strides = array<i32>} : memref<2x4x16x32xf32, #tpu.memory_space<vmem>>, vector<2x4x16x32xf32>,
    return
  }
}

</mosaic_0001>

<bundles_post_ra>
// kernel: tpu_custom_call.1
= control target key start
LH: loop header
LB: loop body
LE: loop exit
PB: predicated region body
PF: predicated region fallthrough
CT: control target
= control target key end

     0   :  { %9 = vsyncpa [#allocation3], 0  ;;  %s342_s0 = inlined_call_operand.hbm [shape: f32[2,4,16,32], index: 0, kind: input, shape index: {}]   ;;  %s343_s1 = inlined_call_operand.hbm [shape: f32[2,4,16,32], index: 1, kind: input, shape index: {}]   ;;  %s344_s2 = inlined_call_operand.hbm [shape: f32[2,4,16,32], index: 2, kind: output, shape index: {0}]   ;;  %s345_s3 = inlined_call_operand.hbm [shape: f32[2,4,16,32], index: 3, kind: output, shape index: {1}]  }
   0x1   :  { %10 = vsyncpa [#allocation6], 0 }
   0x2   :  { %11 = vsyncpa [#allocation4], 0 }
   0x3   :  { %12 = vsyncpa [#allocation9], 0  ;;  %s17_s14 = sshll.u32 %s342_s0, 4  ;;  %s260_s15 = smov [#allocation2]   ;;  %s18_s14 = int_to_ptr.hbm [resolvable:$true] %s17_s14 }
   0x4   :  { %s19_s16 = sshll.u32 %s260_s15, 4  ;;  %s30_s19 = sshll.u32 %s343_s1, 4  ;;  %s20_s16 = int_to_ptr.vmem [resolvable:$true] %s19_s16  ;;  %s31_s19 = int_to_ptr.hbm [resolvable:$true] %s30_s19 }
   0x5   :  { %s261_s20 = smov 128   ;;  %s262_s21 = smov 8  }
   0x6   :  { %25 = dma.hbm_to_vmem [thread:$0]  %s18_s14, 2048, %s20_s16, [#allocation3], %s261_s20, %s261_s20, %s262_s21  }
   0x7   :  { %s263_s22 = smov [#allocation5]  }
   0x8   :  { %s32_s23 = sshll.u32 %s263_s22, 4  ;;  %s33_s23 = int_to_ptr.vmem [resolvable:$true] %s32_s23 }
   0x9   :  { %38 = dma.hbm_to_vmem [thread:$0]  %s31_s19, 2048, %s33_s23, [#allocation6], %s261_s20, %s261_s20, %s262_s21  }
   0xa   :  { %252 = dma.done.wait [#allocation3], 2048  }
   0xb   :  { %253 = vsyncadd [#allocation3], 4294965248 }
   0xc   :  { %254 = dma.done.wait [#allocation6], 2048  }
   0xd   :  { %255 = vsyncadd [#allocation6], 4294965248  ;;  %vm63_vm0 = vcmask 261120   ;;  %v47_v0 = vld [vmem:[#allocation2] sm:$0xff]  ;;  %v48_v1 = vld [vmem:[#allocation2 + $0x8] sm:$0xff]  ;;  %s264_s0 = smov [#allocation7]  }
   0xe   :  { %v49_v2 = vld [vmem:[#allocation2 + $0x10] sm:$0xff]  ;;  %64 = vst.msk [vmem:[#allocation7] sm:$0xff] %vm63_vm0, %v47_v0  ;;  %v50_v3 = vld [vmem:[#allocation2 + $0x18] sm:$0xff]  ;;  %v51_v4 = vld [vmem:[#allocation2 + $0x20] sm:$0xff]  ;;  %s116_s1 = sshll.u32 %s264_s0, 4  ;;  %s118_s26 = sshll.u32 %s344_s2, 4  ;;  %s117_s1 = int_to_ptr.vmem [resolvable:$true] %s116_s1  ;;  %s119_s26 = int_to_ptr.hbm [resolvable:$true] %s118_s26 }
   0xf   :  { %65 = vst.msk [vmem:[#allocation7 + $0x8] sm:$0xff] %vm63_vm0, %v48_v1  ;;  %v52_v5 = vld [vmem:[#allocation2 + $0x28] sm:$0xff]  ;;  %v53_v6 = vld [vmem:[#allocation2 + $0x30] sm:$0xff]  ;;  %v54_v7 = vld [vmem:[#allocation2 + $0x38] sm:$0xff]  ;;  %s265_s2 = smov [#allocation8]   ;;  %s131_s30 = sshll.u32 %s345_s3, 4  ;;  %s132_s30 = int_to_ptr.hbm [resolvable:$true] %s131_s30 }
  0x10   :  { %66 = vst.msk [vmem:[#allocation7 + $0x10] sm:$0xff] %vm63_vm0, %v49_v2  ;;  %v55_v8 = vld [vmem:[#allocation2 + $0x40] sm:$0xff]  ;;  %v56_v9 = vld [vmem:[#allocation2 + $0x48] sm:$0xff]  ;;  %v57_v10 = vld [vmem:[#allocation2 + $0x50] sm:$0xff]  ;;  %s129_s27 = sshll.u32 %s265_s2, 4  ;;  %s130_s27 = int_to_ptr.vmem [resolvable:$true] %s129_s27 }
  0x11   :  { %67 = vst.msk [vmem:[#allocation7 + $0x18] sm:$0xff] %vm63_vm0, %v50_v3  ;;  %v58_v11 = vld [vmem:[#allocation2 + $0x58] sm:$0xff]  ;;  %v59_v12 = vld [vmem:[#allocation2 + $0x60] sm:$0xff]  ;;  %v60_v13 = vld [vmem:[#allocation2 + $0x68] sm:$0xff] }
  0x12   :  { %68 = vst.msk [vmem:[#allocation7 + $0x20] sm:$0xff] %vm63_vm0, %v51_v4  ;;  %v61_v14 = vld [vmem:[#allocation2 + $0x70] sm:$0xff]  ;;  %v62_v15 = vld [vmem:[#allocation2 + $0x78] sm:$0xff]  ;;  %v80_v16 = vld [vmem:[#allocation5] sm:$0xff] }
  0x13   :  { %69 = vst.msk [vmem:[#allocation7 + $0x28] sm:$0xff] %vm63_vm0, %v52_v5  ;;  %v81_v17 = vld [vmem:[#allocation5 + $0x8] sm:$0xff]  ;;  %v82_v18 = vld [vmem:[#allocation5 + $0x10] sm:$0xff]  ;;  %v83_v19 = vld [vmem:[#allocation5 + $0x18] sm:$0xff] }
  0x14   :  { %70 = vst.msk [vmem:[#allocation7 + $0x30] sm:$0xff] %vm63_vm0, %v53_v6  ;;  %v84_v20 = vld [vmem:[#allocation5 + $0x20] sm:$0xff]  ;;  %v85_v21 = vld [vmem:[#allocation5 + $0x28] sm:$0xff]  ;;  %v86_v22 = vld [vmem:[#allocation5 + $0x30] sm:$0xff] }
  0x15   :  { %71 = vst.msk [vmem:[#allocation7 + $0x38] sm:$0xff] %vm63_vm0, %v54_v7  ;;  %v87_v23 = vld [vmem:[#allocation5 + $0x38] sm:$0xff]  ;;  %v88_v24 = vld [vmem:[#allocation5 + $0x40] sm:$0xff]  ;;  %v89_v25 = vld [vmem:[#allocation5 + $0x48] sm:$0xff] }
  0x16   :  { %72 = vst.msk [vmem:[#allocation7 + $0x40] sm:$0xff] %vm63_vm0, %v55_v8  ;;  %v90_v26 = vld [vmem:[#allocation5 + $0x50] sm:$0xff]  ;;  %v91_v27 = vld [vmem:[#allocation5 + $0x58] sm:$0xff]  ;;  %v92_v28 = vld [vmem:[#allocation5 + $0x60] sm:$0xff] }
  0x17   :  { %73 = vst.msk [vmem:[#allocation7 + $0x48] sm:$0xff] %vm63_vm0, %v56_v9  ;;  %v93_v29 = vld [vmem:[#allocation5 + $0x68] sm:$0xff]  ;;  %v94_v30 = vld [vmem:[#allocation5 + $0x70] sm:$0xff]  ;;  %v95_v31 = vld [vmem:[#allocation5 + $0x78] sm:$0xff] }
  0x18   :  { %74 = vst.msk [vmem:[#allocation7 + $0x50] sm:$0xff] %vm63_vm0, %v57_v10 }
  0x19   :  { %75 = vst.msk [vmem:[#allocation7 + $0x58] sm:$0xff] %vm63_vm0, %v58_v11 }
  0x1a   :  { %76 = vst.msk [vmem:[#allocation7 + $0x60] sm:$0xff] %vm63_vm0, %v59_v12 }
  0x1b   :  { %77 = vst.msk [vmem:[#allocation7 + $0x68] sm:$0xff] %vm63_vm0, %v60_v13 }
  0x1c   :  { %78 = vst.msk [vmem:[#allocation7 + $0x70] sm:$0xff] %vm63_vm0, %v61_v14 }
  0x1d   :  { %79 = vst.msk [vmem:[#allocation7 + $0x78] sm:$0xff] %vm63_vm0, %v62_v15 }
  0x1e   :  { %96 = vst.msk [vmem:[#allocation8] sm:$0xff] %vm63_vm0, %v80_v16  ;;  %124 = dma.vmem_to_hbm [thread:$0]  %s117_s1, 2048, %s119_s26, [#allocation4], %s261_s20, %s261_s20, %s262_s21  }
  0x1f   :  { %97 = vst.msk [vmem:[#allocation8 + $0x8] sm:$0xff] %vm63_vm0, %v81_v17 }
  0x20   :  { %98 = vst.msk [vmem:[#allocation8 + $0x10] sm:$0xff] %vm63_vm0, %v82_v18 }
  0x21   :  { %99 = vst.msk [vmem:[#allocation8 + $0x18] sm:$0xff] %vm63_vm0, %v83_v19 }
  0x22   :  { %100 = vst.msk [vmem:[#allocation8 + $0x20] sm:$0xff] %vm63_vm0, %v84_v20 }
  0x23   :  { %101 = vst.msk [vmem:[#allocation8 + $0x28] sm:$0xff] %vm63_vm0, %v85_v21 }
  0x24   :  { %102 = vst.msk [vmem:[#allocation8 + $0x30] sm:$0xff] %vm63_vm0, %v86_v22 }
  0x25   :  { %103 = vst.msk [vmem:[#allocation8 + $0x38] sm:$0xff] %vm63_vm0, %v87_v23 }
  0x26   :  { %104 = vst.msk [vmem:[#allocation8 + $0x40] sm:$0xff] %vm63_vm0, %v88_v24 }
  0x27   :  { %105 = vst.msk [vmem:[#allocation8 + $0x48] sm:$0xff] %vm63_vm0, %v89_v25 }
  0x28   :  { %106 = vst.msk [vmem:[#allocation8 + $0x50] sm:$0xff] %vm63_vm0, %v90_v26 }
  0x29   :  { %107 = vst.msk [vmem:[#allocation8 + $0x58] sm:$0xff] %vm63_vm0, %v91_v27 }
  0x2a   :  { %108 = vst.msk [vmem:[#allocation8 + $0x60] sm:$0xff] %vm63_vm0, %v92_v28 }
  0x2b   :  { %109 = vst.msk [vmem:[#allocation8 + $0x68] sm:$0xff] %vm63_vm0, %v93_v29 }
  0x2c   :  { %110 = vst.msk [vmem:[#allocation8 + $0x70] sm:$0xff] %vm63_vm0, %v94_v30 }
  0x2d   :  { %111 = vst.msk [vmem:[#allocation8 + $0x78] sm:$0xff] %vm63_vm0, %v95_v31 }
  0x2e   :  { %137 = dma.vmem_to_hbm [thread:$0]  %s130_s27, 2048, %s132_s30, [#allocation9], %s261_s20, %s261_s20, %s262_s21  }
  0x2f   :  { %256 = dma.done.wait [#allocation4], 2048  }
  0x30   :  { %257 = vsyncadd [#allocation4], 4294965248 }
  0x31   :  { %258 = dma.done.wait [#allocation9], 2048  }
  0x32   :  { %259 = vsyncadd [#allocation9], 4294965248 }
  0x33   :  { %146 = vsyncpa [#allocation3], 1 }
  0x34   :  { %147 = vsyncpa [#allocation6], 1 }
  0x35   :  { %148 = vsyncpa [#allocation4], 1 }
  0x36   :  { %149 = vsyncpa [#allocation9], 1 }

</bundles_post_ra>
